<compile_context>
chip_gen: v6e
topology: v6e:2x2x1
jax: 0.10.0
libtpu: 0.0.40
codegen_flags: <defaults>
</compile_context>

<pallas_src>
import jax
import jax.numpy as jnp
from jax.experimental import pallas as pl
from jax.experimental.pallas import tpu as pltpu

B, C, H, W = 2, 4, 16, 16
D = C * H * W          # 1024 flattened features
HID = 32               # encoder/decoder hidden width
LAT = 8                # latent dim (mu / log_var / z)
POSE = 4               # pose dim
BP = 8                 # batch padded to sublane granularity

OUTW = 128             # packed small-output width (mu|lv|z|pose|0 ...)
SLAB_W = 2 * OUTW      # params-slab lane width (heads weight needs two 128 layouts)

# ---- params-slab row layout (8-aligned static offsets) ----
R_WH = 0               # rows [0, 32)   : fused heads weight (HID, 256)
R_WD1 = HID            # rows [32, 160) : padded decoder-1 weight (128, 128) in cols 0:128
R_BE = R_WD1 + OUTW    # row 160        : encoder bias (cols 0:HID)
R_BH = R_BE + 8        # row 168        : fused heads bias (256-wide layout)
R_BD1 = R_BH + 8       # row 176        : decoder-1 bias (cols 0:HID; col HID = 1.0 for bd2 fold)
R_EPS = R_BD1 + 8      # rows [184,192) : eps placed in the z-slot lanes
SLAB_R = R_EPS + BP    # 192 rows total


def _vae_kernel(x_ref, we_ref, slab_ref, wd2_ref, recon_ref, small_ref):
    x = x_ref[...]                                            # (BP, D) f32
    we = we_ref[...].astype(jnp.float32)                      # bf16 weight, f32 math

    # ---- encoder trunk: one matmul + ReLU ----
    h = jnp.maximum(
        jnp.dot(x, we, preferred_element_type=jnp.float32)
        + slab_ref[R_BE:R_BE + 1, 0:HID], 0.0)                # (BP, HID)

    # ---- fused heads: ONE matmul produces (BP, 256)
    #   cols   0:128 -> [mu | log_var | mu(copy, z slot) | pose | 0...]
    #   cols 128:256 -> [0 | 0 | log_var (z slot) | 0 ...]
    heads = (jnp.dot(h, slab_ref[R_WH:R_WH + HID, :],
                     preferred_element_type=jnp.float32)
             + slab_ref[R_BH:R_BH + 1, :])                    # (BP, 256)
    heads_a = heads[:, 0:OUTW]                                # mu|lv|mu|pose|0
    heads_b = heads[:, OUTW:2 * OUTW]                         # 0 |0 |lv|0   |0

    # ---- reparameterize in the z-slot lanes: z = mu + exp(0.5*log_var) * eps ----
    lane = jax.lax.broadcasted_iota(jnp.int32, (BP, OUTW), 1)
    z_slot = (lane >= 2 * LAT) & (lane < 3 * LAT)
    eps = slab_ref[R_EPS:R_EPS + BP, 0:OUTW]                  # eps lives at lanes 16:24
    packed = heads_a + jnp.where(z_slot, jnp.exp(0.5 * heads_b) * eps, 0.0)

    # single lane-dense store of mu|log_var|z|pose
    small_ref[...] = packed                                   # (BP, 128)

    # ---- decoder-1: one matmul on the packed slab (wdz/wdp live at rows 16:28) ----
    hd = jnp.maximum(
        jnp.dot(packed, slab_ref[R_WD1:R_WD1 + OUTW, 0:OUTW],
                preferred_element_type=jnp.float32)
        + slab_ref[R_BD1:R_BD1 + 1, 0:OUTW], 0.0)             # (BP, 128); lane HID == 1.0

    # ---- decoder-2: bd2 folded into row HID of the augmented weight ----
    wd2 = wd2_ref[...].astype(jnp.float32)                    # (128, D)
    recon_ref[...] = jnp.dot(hd, wd2, preferred_element_type=jnp.float32)


def _pack_inputs(params, eps):
    """Host-side packing of all weights/biases/eps into 3 arrays (2 bf16, 1 f32)."""
    (we, be, wmu, bmu, wlv, blv, wp, bp, wdz, wdp, bd1, wd2, bd2) = params

    slab = jnp.zeros((SLAB_R, SLAB_W), jnp.float32)
    # fused heads weight
    slab = slab.at[R_WH:R_WH + HID, 0:LAT].set(wmu)
    slab = slab.at[R_WH:R_WH + HID, LAT:2 * LAT].set(wlv)
    slab = slab.at[R_WH:R_WH + HID, 2 * LAT:3 * LAT].set(wmu)          # z slot pre-filled with mu
    slab = slab.at[R_WH:R_WH + HID, 3 * LAT:3 * LAT + POSE].set(wp)
    slab = slab.at[R_WH:R_WH + HID, OUTW + 2 * LAT:OUTW + 3 * LAT].set(wlv)  # lv for exp()
    # fused decoder-1 weight: rows index lanes of `packed`
    slab = slab.at[R_WD1 + 2 * LAT:R_WD1 + 3 * LAT, 0:HID].set(wdz)    # z rows
    slab = slab.at[R_WD1 + 3 * LAT:R_WD1 + 3 * LAT + POSE, 0:HID].set(wdp)  # pose rows
    # biases
    slab = slab.at[R_BE, 0:HID].set(be[0])
    slab = slab.at[R_BH, 0:LAT].set(bmu[0])
    slab = slab.at[R_BH, LAT:2 * LAT].set(blv[0])
    slab = slab.at[R_BH, 2 * LAT:3 * LAT].set(bmu[0])
    slab = slab.at[R_BH, 3 * LAT:3 * LAT + POSE].set(bp[0])
    slab = slab.at[R_BH, OUTW + 2 * LAT:OUTW + 3 * LAT].set(blv[0])
    slab = slab.at[R_BD1, 0:HID].set(bd1[0])
    slab = slab.at[R_BD1, HID].set(1.0)                       # constant-1 lane -> bd2 fold
    # eps in the z-slot lanes (rows B:BP stay zero)
    slab = slab.at[R_EPS:R_EPS + B, 2 * LAT:3 * LAT].set(eps)

    # big weights as bf16 (halves DMA bytes); decoder-2 bias folded into row HID
    we_bf16 = we.astype(jnp.bfloat16)
    wd2_aug = jnp.zeros((OUTW, D), jnp.float32)
    wd2_aug = wd2_aug.at[0:HID, :].set(wd2)
    wd2_aug = wd2_aug.at[HID, :].set(bd2[0])
    wd2_aug = wd2_aug.astype(jnp.bfloat16)
    return we_bf16, slab, wd2_aug


def affinity_vae_forward(x_nchw, packed_inputs):
    """Returns (x_recon[NCHW], mu, log_var, z, pose), mirroring the torch forward."""
    we_bf16, slab, wd2_aug = packed_inputs
    xb = jnp.zeros((BP, D), jnp.float32).at[:B].set(
        x_nchw.reshape(B, D).astype(jnp.float32))
    vmem = pl.BlockSpec(memory_space=pltpu.MemorySpace.VMEM)
    recon, small = pl.pallas_call(
        _vae_kernel,
        out_shape=(
            jax.ShapeDtypeStruct((BP, D), jnp.float32),       # reconstruction (lane-dense)
            jax.ShapeDtypeStruct((BP, OUTW), jnp.float32),    # packed mu|lv|z|pose
        ),
        in_specs=[vmem, vmem, vmem, vmem],
        out_specs=(vmem, vmem),
    )(xb, we_bf16, slab, wd2_aug)
    recon = recon[:B].reshape(B, C, H, W)
    mu = small[:B, 0:LAT]
    lv = small[:B, LAT:2 * LAT]
    z = small[:B, 2 * LAT:3 * LAT]
    pose = small[:B, 3 * LAT:3 * LAT + POSE]
    return recon, mu, lv, z, pose


def _make_params(key):
    ks = jax.random.split(key, 13)

    def lin(k, fan_in, fan_out):
        s = 1.0 / jnp.sqrt(fan_in)
        return jax.random.uniform(k, (fan_in, fan_out), jnp.float32, -s, s)

    def bias(k, n):
        return jax.random.uniform(k, (1, n), jnp.float32, -0.1, 0.1)

    we = lin(ks[0], D, HID);     be = bias(ks[1], HID)
    wmu = lin(ks[2], HID, LAT);  bmu = bias(ks[3], LAT)
    wlv = lin(ks[4], HID, LAT);  blv = bias(ks[5], LAT)
    wp = lin(ks[6], HID, POSE);  bp = bias(ks[7], POSE)
    wdz = lin(ks[8], LAT, HID)
    wdp = lin(ks[9], POSE, HID)
    bd1 = bias(ks[10], HID)
    wd2 = lin(ks[11], HID, D);   bd2 = bias(ks[12], D)
    return (we, be, wmu, bmu, wlv, blv, wp, bp, wdz, wdp, bd1, wd2, bd2)


def _reference(x_nchw, params, eps):
    (we, be, wmu, bmu, wlv, blv, wp, bp, wdz, wdp, bd1, wd2, bd2) = params
    # mirror the bf16 rounding applied to the kernel's large weights / folded bias
    we = we.astype(jnp.bfloat16).astype(jnp.float32)
    wd2 = wd2.astype(jnp.bfloat16).astype(jnp.float32)
    bd2 = bd2.astype(jnp.bfloat16).astype(jnp.float32)
    xb = x_nchw.reshape(B, D)
    h = jnp.maximum(xb @ we + be, 0.0)
    mu = h @ wmu + bmu
    lv = h @ wlv + blv
    pose = h @ wp + bp
    z = mu + jnp.exp(0.5 * lv) * eps
    hd = jnp.maximum(z @ wdz + pose @ wdp + bd1, 0.0)
    recon = hd @ wd2 + bd2
    return recon.reshape(B, C, H, W), mu, lv, z, pose


if __name__ == "__main__":
    key = jax.random.PRNGKey(0)
    kx, kp, ke = jax.random.split(key, 3)
    x = jax.random.normal(kx, (B, C, H, W), jnp.float32)
    params = _make_params(kp)
    eps = jax.random.normal(ke, (B, LAT), jnp.float32)

    packed_inputs = _pack_inputs(params, eps)
    outs = affinity_vae_forward(x, packed_inputs)
    outs = jax.block_until_ready(outs)

    refs = _reference(x, params, eps)
    names = ("recon", "mu", "log_var", "z", "pose")
    for name, o, r in zip(names, outs, refs):
        assert o.shape == r.shape and o.dtype == r.dtype, name
        # tolerance covers Mosaic-vs-XLA f32 matmul pass-precision differences only;
        # the bf16 weight rounding is mirrored in the reference.
        assert jnp.allclose(o, r, rtol=1e-3, atol=1e-3), f"mismatch vs reference: {name}"

    print("KERNEL_OK")
</pallas_src>

<mosaic_0001>
module attributes {stable_mosaic.version = 11 : i64} {
  func.func @_vae_kernel(%arg0: memref<8x1024xf32, #tpu.memory_space<vmem>>, %arg1: memref<1024x32xbf16, #tpu.memory_space<vmem>>, %arg2: memref<192x256xf32, #tpu.memory_space<vmem>>, %arg3: memref<128x1024xbf16, #tpu.memory_space<vmem>>, %arg4: memref<8x1024xf32, #tpu.memory_space<vmem>>, %arg5: memref<8x128xf32, #tpu.memory_space<vmem>>) attributes {dimension_semantics = [], scalar_prefetch = 0 : i64, scratch_operands = 0 : i64, tpu.core_type = #tpu.core_type<tc>} {
    %c0 = arith.constant 0 : index
    %c0_0 = arith.constant 0 : index
    %0 = vector.load %arg0[%c0, %c0_0] : memref<8x1024xf32, #tpu.memory_space<vmem>>, vector<8x1024xf32>
    %c0_1 = arith.constant 0 : index
    %c0_2 = arith.constant 0 : index
    %1 = vector.load %arg1[%c0_1, %c0_2] : memref<1024x32xbf16, #tpu.memory_space<vmem>>, vector<1024x32xbf16>
    %2 = arith.extf %1 : vector<1024x32xbf16> to vector<1024x32xf32>
    %cst = arith.constant dense<0.000000e+00> : vector<8x32xf32>
    %3 = tpu.matmul %0, %2, %cst {dimension_numbers = #tpu.dot_dimension_numbers<[1], [0], [0], [1], [0, 0, 1, 1], [], []>} : vector<8x1024xf32>, vector<1024x32xf32>, vector<8x32xf32> -> vector<8x32xf32>
    %c160 = arith.constant 160 : index
    %c0_3 = arith.constant 0 : index
    %4 = vector.load %arg2[%c160, %c0_3] : memref<192x256xf32, #tpu.memory_space<vmem>>, vector<1x32xf32>
    %5 = vector.broadcast %4 : vector<1x32xf32> to vector<8x32xf32>
    %6 = arith.addf %3, %5 : vector<8x32xf32>
    %cst_4 = arith.constant 0.000000e+00 : f32
    %7 = vector.broadcast %cst_4 : f32 to vector<8x32xf32>
    %8 = arith.maximumf %6, %7 : vector<8x32xf32>
    %c0_5 = arith.constant 0 : index
    %c0_6 = arith.constant 0 : index
    %9 = vector.load %arg2[%c0_5, %c0_6] : memref<192x256xf32, #tpu.memory_space<vmem>>, vector<32x256xf32>
    %cst_7 = arith.constant dense<0.000000e+00> : vector<8x256xf32>
    %10 = tpu.matmul %8, %9, %cst_7 {dimension_numbers = #tpu.dot_dimension_numbers<[1], [0], [0], [1], [0, 0, 1, 1], [], []>} : vector<8x32xf32>, vector<32x256xf32>, vector<8x256xf32> -> vector<8x256xf32>
    %c168 = arith.constant 168 : index
    %c0_8 = arith.constant 0 : index
    %11 = vector.load %arg2[%c168, %c0_8] : memref<192x256xf32, #tpu.memory_space<vmem>>, vector<1x256xf32>
    %12 = vector.broadcast %11 : vector<1x256xf32> to vector<8x256xf32>
    %13 = arith.addf %10, %12 : vector<8x256xf32>
    %14 = vector.extract_strided_slice %13 {offsets = [0, 0], sizes = [8, 128], strides = [1, 1]} : vector<8x256xf32> to vector<8x128xf32>
    %15 = vector.extract_strided_slice %13 {offsets = [0, 128], sizes = [8, 128], strides = [1, 1]} : vector<8x256xf32> to vector<8x128xf32>
    %16 = tpu.iota {dimensions = array<i32: 1>} : vector<8x128xi32>
    %c16_i32 = arith.constant 16 : i32
    %17 = vector.broadcast %c16_i32 : i32 to vector<8x128xi32>
    %18 = arith.cmpi sge, %16, %17 : vector<8x128xi32>
    %c24_i32 = arith.constant 24 : i32
    %19 = vector.broadcast %c24_i32 : i32 to vector<8x128xi32>
    %20 = arith.cmpi slt, %16, %19 : vector<8x128xi32>
    %21 = arith.andi %18, %20 : vector<8x128xi1>
    %c184 = arith.constant 184 : index
    %c0_9 = arith.constant 0 : index
    %22 = vector.load %arg2[%c184, %c0_9] : memref<192x256xf32, #tpu.memory_space<vmem>>, vector<8x128xf32>
    %cst_10 = arith.constant 5.000000e-01 : f32
    %23 = vector.broadcast %cst_10 : f32 to vector<8x128xf32>
    %24 = arith.mulf %23, %15 : vector<8x128xf32>
    %25 = math.exp %24 : vector<8x128xf32>
    %26 = arith.mulf %25, %22 : vector<8x128xf32>
    %cst_11 = arith.constant 0.000000e+00 : f32
    %27 = vector.broadcast %cst_11 : f32 to vector<8x128xf32>
    %28 = arith.select %21, %26, %27 : vector<8x128xi1>, vector<8x128xf32>
    %29 = arith.addf %14, %28 : vector<8x128xf32>
    %c0_12 = arith.constant 0 : index
    %c0_13 = arith.constant 0 : index
    %30 = vector.load %arg5[%c0_12, %c0_13] : memref<8x128xf32, #tpu.memory_space<vmem>>, vector<8x128xf32>
    tpu.vector_store %arg5[%c0_12, %c0_13], %29 {strides = array<i32>} : memref<8x128xf32, #tpu.memory_space<vmem>>, vector<8x128xf32>,
    %c32 = arith.constant 32 : index
    %c0_14 = arith.constant 0 : index
    %31 = vector.load %arg2[%c32, %c0_14] : memref<192x256xf32, #tpu.memory_space<vmem>>, vector<128x128xf32>
    %cst_15 = arith.constant dense<0.000000e+00> : vector<8x128xf32>
    %32 = tpu.matmul %29, %31, %cst_15 {dimension_numbers = #tpu.dot_dimension_numbers<[1], [0], [0], [1], [0, 0, 1, 1], [], []>} : vector<8x128xf32>, vector<128x128xf32>, vector<8x128xf32> -> vector<8x128xf32>
    %c176 = arith.constant 176 : index
    %c0_16 = arith.constant 0 : index
    %33 = vector.load %arg2[%c176, %c0_16] : memref<192x256xf32, #tpu.memory_space<vmem>>, vector<1x128xf32>
    %34 = vector.broadcast %33 : vector<1x128xf32> to vector<8x128xf32>
    %35 = arith.addf %32, %34 : vector<8x128xf32>
    %cst_17 = arith.constant 0.000000e+00 : f32
    %36 = vector.broadcast %cst_17 : f32 to vector<8x128xf32>
    %37 = arith.maximumf %35, %36 : vector<8x128xf32>
    %c0_18 = arith.constant 0 : index
    %c0_19 = arith.constant 0 : index
    %38 = vector.load %arg3[%c0_18, %c0_19] : memref<128x1024xbf16, #tpu.memory_space<vmem>>, vector<128x1024xbf16>
    %39 = arith.extf %38 : vector<128x1024xbf16> to vector<128x1024xf32>
    %cst_20 = arith.constant dense<0.000000e+00> : vector<8x1024xf32>
    %40 = tpu.matmul %37, %39, %cst_20 {dimension_numbers = #tpu.dot_dimension_numbers<[1], [0], [0], [1], [0, 0, 1, 1], [], []>} : vector<8x128xf32>, vector<128x1024xf32>, vector<8x1024xf32> -> vector<8x1024xf32>
    %c0_21 = arith.constant 0 : index
    %c0_22 = arith.constant 0 : index
    %41 = vector.load %arg4[%c0_21, %c0_22] : memref<8x1024xf32, #tpu.memory_space<vmem>>, vector<8x1024xf32>
    tpu.vector_store %arg4[%c0_21, %c0_22], %40 {strides = array<i32>} : memref<8x1024xf32, #tpu.memory_space<vmem>>, vector<8x1024xf32>,
    return
  }
}

</mosaic_0001>

<bundles_post_ra>
// kernel: tpu_custom_call.1
= control target key start
LH: loop header
LB: loop body
LE: loop exit
PB: predicated region body
PF: predicated region fallthrough
CT: control target
= control target key end

     0   :  { %11 = vsyncpa [#allocation3], 0  ;;  %s2364_s0 = inlined_call_operand.vmem [shape: f32[8,1024], index: 0, kind: input, shape index: {}]   ;;  %s2365_s1 = inlined_call_operand.vmem [shape: bf16[1024,32], index: 1, kind: input, shape index: {}]   ;;  %s2366_s2 = inlined_call_operand.hbm [shape: f32[192,256], index: 2, kind: input, shape index: {}]   ;;  %s2367_s3 = inlined_call_operand.vmem [shape: bf16[128,1024], index: 3, kind: input, shape index: {}]   ;;  %s2368_s4 = inlined_call_operand.hbm [shape: f32[8,1024], index: 4, kind: output, shape index: {0}]   ;;  %s2369_s5 = inlined_call_operand.hbm [shape: f32[8,128], index: 5, kind: output, shape index: {1}]  }
   0x1   :  { %12 = vsyncpa [#allocation4], 0 }
   0x2   :  { %13 = vsyncpa [#allocation7], 0  ;;  %s1878_s18 = smov [#allocation2]  }
   0x3   :  { %s23_s19 = sshll.u32 %s1878_s18, 4  ;;  %s24_s19 = int_to_ptr.vmem [resolvable:$true] %s23_s19 }
   0x4   :  { %s1820_s20 = scalar_lea.vmem %s24_s19, 6144  ;;  %p1825_p1 = scmp.lt.s32.totalorder %s24_s19, %s24_s19 }
   0x5   :  { %p1821_p0 = scmp.ne.s32.totalorder %s24_s19, %s1820_s20  ;;  %p1826_p2 = scmp.lt.s32.totalorder %s1820_s20, %s1820_s20 }
   0x7   :  { %p1827_p3 = por %p1826_p2, %p1825_p1 }
   0x9   :  { %p1828_p4 = pnand %p1827_p3, %p1821_p0 }
   0xb   :  { %1831 = shalt.err (!%p1828_p4)
}
   0xc   :  { %s1879_s21 = smov 256   ;;  %s1880_s22 = smov 16  }
   0xd   :  { %29 = dma.hbm_to_vmem [thread:$0]  %s2366_s2, 6144, %s24_s19, [#allocation3], %s1879_s21, %s1879_s21, %s1880_s22  }
   0xe   :  { %1872 = dma.done.wait [#allocation3], 6144  }
   0xf   :  { %1873 = vsyncadd [#allocation3], 4294961152  ;;  %v1562_v0 = vld [vmem:[%s2365_s1 + $0x78] sm:$0xff]   ;;  %v1561_v8 = vld [vmem:[%s2365_s1 + $0x70] sm:$0xff]   ;;  %vm602_vm0 = vcmask 261120   ;;  %vm1882_vm1 = vmmov 0  }
  0x10   :  { %v1578_v1 = vld [vmem:[%s2365_s1 + $0xf8] sm:$0xff]   ;;  %v1354_v3 = vunpack.c.l.bf16 %v1562_v0  ;;  %v1355_v4 = vunpack.c.h.bf16 %v1562_v0  ;;  %v1577_v9 = vld [vmem:[%s2365_s1 + $0xf0] sm:$0xff]   ;;  %v1351_v16 = vunpack.c.h.bf16 %v1561_v8  ;;  %v1560_v20 = vld [vmem:[%s2365_s1 + $0x68] sm:$0xff]   ;;  %v1350_v22 = vunpack.c.l.bf16 %v1561_v8 }
  0x11   :  { %v1554_v2 = vld [vmem:[%s2365_s1 + $0x38] sm:$0xff]   ;;  %v1418_v5 = vunpack.c.l.bf16 %v1578_v1  ;;  %v1419_v6 = vunpack.c.h.bf16 %v1578_v1  ;;  %v1553_v14 = vld [vmem:[%s2365_s1 + $0x30] sm:$0xff]   ;;  %v1415_v17 = vunpack.c.h.bf16 %v1577_v9  ;;  %v1576_v21 = vld [vmem:[%s2365_s1 + $0xe8] sm:$0xff]   ;;  %v1414_v23 = vunpack.c.l.bf16 %v1577_v9 }
  0x12   :  { %v1570_v7 = vld [vmem:[%s2365_s1 + $0xb8] sm:$0xff]   ;;  %v1322_v10 = vunpack.c.l.bf16 %v1554_v2  ;;  %v1323_v11 = vunpack.c.h.bf16 %v1554_v2  ;;  %v1569_v15 = vld [vmem:[%s2365_s1 + $0xb0] sm:$0xff]   ;;  %1611 = vmatprep.subr.mxu0 %v1355_v4  ;;  %v1319_v18 = vunpack.c.h.bf16 %v1553_v14  ;;  %v1552_v24 = vld [vmem:[%s2365_s1 + $0x28] sm:$0xff]   ;;  %v1318_v26 = vunpack.c.l.bf16 %v1553_v14 }
  0x13   :  { %v1386_v12 = vunpack.c.l.bf16 %v1570_v7  ;;  %v1387_v13 = vunpack.c.h.bf16 %v1570_v7  ;;  %1646 = vmatprep.subr.mxu1 %v1419_v6  ;;  %v1383_v19 = vunpack.c.h.bf16 %v1569_v15  ;;  %v1568_v25 = vld [vmem:[%s2365_s1 + $0xa8] sm:$0xff]   ;;  %v1382_v27 = vunpack.c.l.bf16 %v1569_v15  ;;  %v1559_v32 = vld [vmem:[%s2365_s1 + $0x60] sm:$0xff]   ;;  %v1558_v44 = vld [vmem:[%s2365_s1 + $0x58] sm:$0xff]  }
  0x14   :  { %1612 = vmatpush3.msra.mxu0 %v1323_v11  ;;  %v1347_v28 = vunpack.c.h.bf16 %v1560_v20  ;;  %v1411_v29 = vunpack.c.h.bf16 %v1576_v21  ;;  %v1315_v30 = vunpack.c.h.bf16 %v1552_v24  ;;  %v1379_v31 = vunpack.c.h.bf16 %v1568_v25  ;;  %v1575_v33 = vld [vmem:[%s2365_s1 + $0xe0] sm:$0xff]   ;;  %v1574_v45 = vld [vmem:[%s2365_s1 + $0xd8] sm:$0xff]   ;;  %v1557_v56 = vld [vmem:[%s2365_s1 + $0x50] sm:$0xff]  }
  0x15   :  { %1647 = vmatpush3.msra.mxu1 %v1387_v13  ;;  %1613 = vmatprep.subr.mxu0 %v1354_v3  ;;  %v1346_v34 = vunpack.c.l.bf16 %v1560_v20  ;;  %v1410_v35 = vunpack.c.l.bf16 %v1576_v21  ;;  %v1551_v36 = vld [vmem:[%s2365_s1 + $0x20] sm:$0xff]   ;;  %v1314_v38 = vunpack.c.l.bf16 %v1552_v24  ;;  %v1378_v39 = vunpack.c.l.bf16 %v1568_v25  ;;  %v1550_v48 = vld [vmem:[%s2365_s1 + $0x18] sm:$0xff]   ;;  %v1573_v57 = vld [vmem:[%s2365_s1 + $0xd0] sm:$0xff]  }
  0x16   :  { %1648 = vmatprep.subr.mxu1 %v1418_v5  ;;  %1614 = vmatpush3.msra.mxu0 %v1322_v10  ;;  %v1567_v37 = vld [vmem:[%s2365_s1 + $0xa0] sm:$0xff]   ;;  %v1343_v40 = vunpack.c.h.bf16 %v1559_v32  ;;  %v1407_v41 = vunpack.c.h.bf16 %v1575_v33  ;;  %v1311_v42 = vunpack.c.h.bf16 %v1551_v36  ;;  %v1342_v46 = vunpack.c.l.bf16 %v1559_v32  ;;  %v1566_v49 = vld [vmem:[%s2365_s1 + $0x98] sm:$0xff]   ;;  %v1549_v60 = vld [vmem:[%s2365_s1 + $0x10] sm:$0xff]  }
  0x17   :  { %1649 = vmatpush3.msra.mxu1 %v1386_v12  ;;  %1615 = vmatprep.subr.mxu0 %v1351_v16  ;;  %v1375_v43 = vunpack.c.h.bf16 %v1567_v37  ;;  %v1406_v47 = vunpack.c.l.bf16 %v1575_v33  ;;  %v1310_v50 = vunpack.c.l.bf16 %v1551_v36  ;;  %v1374_v51 = vunpack.c.l.bf16 %v1567_v37  ;;  %v1565_v61 = vld [vmem:[%s2365_s1 + $0x90] sm:$0xff]   ;;  %v1556_v4 = vld [vmem:[%s2365_s1 + $0x48] sm:$0xff]   ;;  %v1555_v16 = vld [vmem:[%s2365_s1 + $0x40] sm:$0xff]  }
  0x18   :  { %1650 = vmatprep.subr.mxu1 %v1415_v17  ;;  %1616 = vmatpush3.msra.mxu0 %v1319_v18  ;;  %v1339_v52 = vunpack.c.h.bf16 %v1558_v44  ;;  %v1403_v53 = vunpack.c.h.bf16 %v1574_v45  ;;  %v1307_v54 = vunpack.c.h.bf16 %v1550_v48  ;;  %v1371_v55 = vunpack.c.h.bf16 %v1566_v49  ;;  %v1572_v5 = vld [vmem:[%s2365_s1 + $0xc8] sm:$0xff]   ;;  %v1571_v17 = vld [vmem:[%s2365_s1 + $0xc0] sm:$0xff]   ;;  %v1610_v32 = vld [vmem:[%s2365_s1 + $0x1f8] sm:$0xff]  }
  0x19   :  { %1651 = vmatpush3.msra.mxu1 %v1383_v19  ;;  %1617 = vmatprep.subr.mxu0 %v1350_v22  ;;  %v1338_v58 = vunpack.c.l.bf16 %v1558_v44  ;;  %v1402_v59 = vunpack.c.l.bf16 %v1574_v45  ;;  %v1306_v62 = vunpack.c.l.bf16 %v1550_v48  ;;  %v1370_v63 = vunpack.c.l.bf16 %v1566_v49  ;;  %v1548_v8 = vld [vmem:[%s2365_s1 + $0x8] sm:$0xff]   ;;  %v1293_v20 = vld [vmem:[%s2365_s1] sm:$0xff]   ;;  %v1602_v36 = vld [vmem:[%s2365_s1 + $0x1b8] sm:$0xff]  }
  0x1a   :  { %1652 = vmatprep.subr.mxu1 %v1414_v23  ;;  %1618 = vmatpush3.msra.mxu0 %v1318_v26  ;;  %v1335_v0 = vunpack.c.h.bf16 %v1557_v56  ;;  %v1399_v1 = vunpack.c.h.bf16 %v1573_v57  ;;  %v1303_v2 = vunpack.c.h.bf16 %v1549_v60  ;;  %v1367_v3 = vunpack.c.h.bf16 %v1565_v61  ;;  %v1564_v9 = vld [vmem:[%s2365_s1 + $0x88] sm:$0xff]   ;;  %v1563_v21 = vld [vmem:[%s2365_s1 + $0x80] sm:$0xff]   ;;  %v1593_v44 = vld [vmem:[%s2365_s1 + $0x170] sm:$0xff]  }
  0x1b   :  { %1653 = vmatpush3.msra.mxu1 %v1382_v27  ;;  %1619 = vmatprep.subr.mxu0 %v1347_v28  ;;  %v1334_v6 = vunpack.c.l.bf16 %v1557_v56  ;;  %v1398_v7 = vunpack.c.l.bf16 %v1573_v57  ;;  %v1302_v10 = vunpack.c.l.bf16 %v1549_v60  ;;  %v1366_v11 = vunpack.c.l.bf16 %v1565_v61  ;;  %v36_v33 = vld [vmem:[%s2364_s0 + $0x8] sm:$0xff]  ;;  %v35_v37 = vld [vmem:[%s2364_s0] sm:$0xff]  ;;  %v1609_v45 = vld [vmem:[%s2365_s1 + $0x1f0] sm:$0xff]  }
  0x1c   :  { %1654 = vmatprep.subr.mxu1 %v1411_v29  ;;  %1620 = vmatpush3.msra.mxu0 %v1315_v30  ;;  %v1331_v12 = vunpack.c.h.bf16 %v1556_v4  ;;  %v1395_v13 = vunpack.c.h.bf16 %v1572_v5  ;;  %v1299_v14 = vunpack.c.h.bf16 %v1548_v8  ;;  %v1363_v15 = vunpack.c.h.bf16 %v1564_v9  ;;  %v1594_v30 = vld [vmem:[%s2365_s1 + $0x178] sm:$0xff]   ;;  %v1585_v48 = vld [vmem:[%s2365_s1 + $0x130] sm:$0xff]   ;;  %v1592_v56 = vld [vmem:[%s2365_s1 + $0x168] sm:$0xff]  }
  0x1d   :  { %1655 = vmatpush3.msra.mxu1 %v1379_v31  ;;  %1621 = vmatprep.subr.mxu0 %v1346_v34  ;;  %v1330_v18 = vunpack.c.l.bf16 %v1556_v4  ;;  %v1394_v19 = vunpack.c.l.bf16 %v1572_v5  ;;  %v1298_v22 = vunpack.c.l.bf16 %v1548_v8  ;;  %v1362_v23 = vunpack.c.l.bf16 %v1564_v9  ;;  %v1601_v49 = vld [vmem:[%s2365_s1 + $0x1b0] sm:$0xff]   ;;  %v1608_v57 = vld [vmem:[%s2365_s1 + $0x1e8] sm:$0xff]   ;;  %v1591_v4 = vld [vmem:[%s2365_s1 + $0x160] sm:$0xff]  }
  0x1e   :  { %1656 = vmatprep.subr.mxu1 %v1410_v35  ;;  %1622 = vmatpush3.msra.mxu0 %v1314_v38  ;;  %v1327_v24 = vunpack.c.h.bf16 %v1555_v16  ;;  %v1391_v25 = vunpack.c.h.bf16 %v1571_v17  ;;  %v1295_v26 = vunpack.c.h.bf16 %v1293_v20  ;;  %v1359_v27 = vunpack.c.h.bf16 %v1563_v21  ;;  %v1586_v35 = vld [vmem:[%s2365_s1 + $0x138] sm:$0xff]   ;;  %v1584_v60 = vld [vmem:[%s2365_s1 + $0x128] sm:$0xff]   ;;  %v1607_v5 = vld [vmem:[%s2365_s1 + $0x1e0] sm:$0xff]  }
  0x1f   :  { %1657 = vmatpush3.msra.mxu1 %v1378_v39  ;;  %1623 = vmatprep.subr.mxu0 %v1343_v40  ;;  %v1326_v28 = vunpack.c.l.bf16 %v1555_v16  ;;  %v1390_v29 = vunpack.c.l.bf16 %v1571_v17  ;;  %v1294_v31 = vunpack.c.l.bf16 %v1293_v20  ;;  %v1358_v34 = vunpack.c.l.bf16 %v1563_v21  ;;  %v38_v39 = vld [vmem:[%s2364_s0 + $0x18] sm:$0xff]  ;;  %v1600_v61 = vld [vmem:[%s2365_s1 + $0x1a8] sm:$0xff]   ;;  %v1583_v8 = vld [vmem:[%s2365_s1 + $0x120] sm:$0xff]  }
  0x20   :  { %1658 = vmatprep.subr.mxu1 %v1407_v41  ;;  %1624 = vmatpush3.msra.mxu0 %v1311_v42  ;;  %v1483_v38 = vunpack.c.h.bf16 %v1594_v30  ;;  %v1547_v40 = vunpack.c.h.bf16 %v1610_v32  ;;  %v37_v41 = vld [vmem:[%s2364_s0 + $0x10] sm:$0xff]  ;;  %v1451_v42 = vunpack.c.h.bf16 %v1586_v35  ;;  %v1599_v9 = vld [vmem:[%s2365_s1 + $0x1a0] sm:$0xff]   ;;  %v1590_v16 = vld [vmem:[%s2365_s1 + $0x158] sm:$0xff]  }
  0x21   :  { %1659 = vmatpush3.msra.mxu1 %v1375_v43  ;;  %1625 = vmatprep.subr.mxu0 %v1342_v46  ;;  %v1515_v43 = vunpack.c.h.bf16 %v1602_v36  ;;  %v1482_v46 = vunpack.c.l.bf16 %v1594_v30  ;;  %v1606_v17 = vld [vmem:[%s2365_s1 + $0x1d8] sm:$0xff]   ;;  %v1466_v30 = vunpack.c.l.bf16 %v1590_v16 }
  0x22   :  { %1660 = vmatprep.subr.mxu1 %v1406_v47  ;;  %1626 = vmatpush3.msra.mxu0 %v1310_v50  ;;  %v1546_v47 = vunpack.c.l.bf16 %v1610_v32  ;;  %v1450_v50 = vunpack.c.l.bf16 %v1586_v35  ;;  %v1582_v20 = vld [vmem:[%s2365_s1 + $0x118] sm:$0xff]   ;;  %v1581_v32 = vld [vmem:[%s2365_s1 + $0x110] sm:$0xff]  }
  0x23   :  { %1661 = vmatpush3.msra.mxu1 %v1374_v51  ;;  %1627 = vmatprep.subr.mxu0 %v1339_v52  ;;  %v1514_v51 = vunpack.c.l.bf16 %v1602_v36  ;;  %v1479_v52 = vunpack.c.h.bf16 %v1593_v44  ;;  %v1598_v21 = vld [vmem:[%s2365_s1 + $0x198] sm:$0xff]  }
  0x24   :  { %1662 = vmatprep.subr.mxu1 %v1403_v53  ;;  %1628 = vmatpush3.msra.mxu0 %v1307_v54  ;;  %v1543_v53 = vunpack.c.h.bf16 %v1609_v45  ;;  %v1447_v54 = vunpack.c.h.bf16 %v1585_v48  ;;  %v1498_v35 = vunpack.c.l.bf16 %v1598_v21 }
  0x25   :  { %1663 = vmatpush3.msra.mxu1 %v1371_v55  ;;  %1629 = vmatprep.subr.mxu0 %v1338_v58  ;;  %v1511_v55 = vunpack.c.h.bf16 %v1601_v49  ;;  %v1478_v58 = vunpack.c.l.bf16 %v1593_v44  ;;  %v1580_v44 = vld [vmem:[%s2365_s1 + $0x108] sm:$0xff]  }
  0x26   :  { %1664 = vmatprep.subr.mxu1 %v1402_v59  ;;  %1630 = vmatpush3.msra.mxu0 %v1306_v62  ;;  %v1542_v59 = vunpack.c.l.bf16 %v1609_v45  ;;  %v1446_v62 = vunpack.c.l.bf16 %v1585_v48  ;;  %v1596_v45 = vld [vmem:[%s2365_s1 + $0x188] sm:$0xff]  }
  0x27   :  { %1665 = vmatpush3.msra.mxu1 %v1370_v63  ;;  %1631 = vmatprep.subr.mxu0 %v1335_v0  ;;  %v1510_v63 = vunpack.c.l.bf16 %v1601_v49  ;;  %v1475_v0 = vunpack.c.h.bf16 %v1592_v56 }
  0x28   :  { %1666 = vmatprep.subr.mxu1 %v1399_v1  ;;  %1632 = vmatpush3.msra.mxu0 %v1303_v2  ;;  %v1539_v1 = vunpack.c.h.bf16 %v1608_v57  ;;  %v1443_v2 = vunpack.c.h.bf16 %v1584_v60 }
  0x29   :  { %1667 = vmatpush3.msra.mxu1 %v1367_v3  ;;  %1633 = vmatprep.subr.mxu0 %v1334_v6  ;;  %v1507_v3 = vunpack.c.h.bf16 %v1600_v61  ;;  %v1474_v6 = vunpack.c.l.bf16 %v1592_v56  ;;  %v1579_v56 = vld [vmem:[%s2365_s1 + $0x100] sm:$0xff]  }
  0x2a   :  { %1668 = vmatprep.subr.mxu1 %v1398_v7  ;;  %1634 = vmatpush3.msra.mxu0 %v1302_v10  ;;  %v1538_v7 = vunpack.c.l.bf16 %v1608_v57  ;;  %v1442_v10 = vunpack.c.l.bf16 %v1584_v60  ;;  %v1595_v57 = vld [vmem:[%s2365_s1 + $0x180] sm:$0xff]  }
  0x2b   :  { %1669 = vmatpush3.msra.mxu1 %v1366_v11  ;;  %1635 = vmatprep.subr.mxu0 %v1331_v12  ;;  %v1506_v11 = vunpack.c.l.bf16 %v1600_v61  ;;  %v1471_v12 = vunpack.c.h.bf16 %v1591_v4 }
  0x2c   :  { %1670 = vmatprep.subr.mxu1 %v1395_v13  ;;  %1636 = vmatpush3.msra.mxu0 %v1299_v14  ;;  %v1535_v13 = vunpack.c.h.bf16 %v1607_v5  ;;  %v1439_v14 = vunpack.c.h.bf16 %v1583_v8 }
  0x2d   :  { %1671 = vmatpush3.msra.mxu1 %v1363_v15  ;;  %1637 = vmatprep.subr.mxu0 %v1330_v18  ;;  %v1503_v15 = vunpack.c.h.bf16 %v1599_v9  ;;  %v1470_v18 = vunpack.c.l.bf16 %v1591_v4  ;;  %v1486_v4 = vunpack.c.l.bf16 %v1595_v57 }
  0x2e   :  { %1672 = vmatprep.subr.mxu1 %v1394_v19  ;;  %1638 = vmatpush3.msra.mxu0 %v1298_v22  ;;  %v1534_v19 = vunpack.c.l.bf16 %v1607_v5  ;;  %v1438_v22 = vunpack.c.l.bf16 %v1583_v8  ;;  %v42_v5 = vld [vmem:[%s2364_s0 + $0x38] sm:$0xff] }
  0x2f   :  { %1673 = vmatpush3.msra.mxu1 %v1362_v23  ;;  %1639 = vmatprep.subr.mxu0 %v1327_v24  ;;  %v1502_v23 = vunpack.c.l.bf16 %v1599_v9  ;;  %v1467_v24 = vunpack.c.h.bf16 %v1590_v16  ;;  %v588_v8 = vld [vmem:[#allocation2 + $0x38] sm:$0xff]  ;;  %v587_v9 = vld [vmem:[#allocation2 + $0x30] sm:$0xff]  ;;  %v1881_v16 = vmov 0.0  }
  0x30   :  { %1674 = vmatprep.subr.mxu1 %v1391_v25  ;;  %1640 = vmatpush3.msra.mxu0 %v1295_v26  ;;  %v1531_v25 = vunpack.c.h.bf16 %v1606_v17  ;;  %v1435_v26 = vunpack.c.h.bf16 %v1582_v20 }
  0x31   :  { %1675 = vmatpush3.msra.mxu1 %v1359_v27  ;;  %1641 = vmatprep.subr.mxu0 %v1326_v28  ;;  %v1499_v27 = vunpack.c.h.bf16 %v1598_v21  ;;  %v1589_v28 = vld [vmem:[%s2365_s1 + $0x150] sm:$0xff]  }
  0x32   :  { %1676 = vmatprep.subr.mxu1 %v1390_v29  ;;  %1642 = vmatpush3.msra.mxu0 %v1294_v31  ;;  %v1605_v29 = vld [vmem:[%s2365_s1 + $0x1d0] sm:$0xff]   ;;  %v1530_v31 = vunpack.c.l.bf16 %v1606_v17  ;;  %v1463_v36 = vunpack.c.h.bf16 %v1589_v28 }
  0x33   :  { %364 = vmatprep.mubr.f32.mxu0 %v36_v33  ;;  %1677 = vmatpush3.msra.mxu1 %v1358_v34  ;;  %v1597_v33 = vld [vmem:[%s2365_s1 + $0x190] sm:$0xff]   ;;  %v1434_v34 = vunpack.c.l.bf16 %v1582_v20 }
  0x34   :  { %365 = vmatmul.mubr.f32.vlgmr.msra.gmra.mxu0 %v35_v37  ;;  %434 = vmatprep.mubr.f32.mxu1 %v38_v39  ;;  %v1527_v37 = vunpack.c.h.bf16 %v1605_v29  ;;  %v1495_v39 = vunpack.c.h.bf16 %v1597_v33  ;;  %v705_v17 = vld [vmem:[#allocation2 + $0x130] sm:$0xff] }
  0x35   :  { %1681 = vmatprep.subr.mxu0 %v1483_v38  ;;  %1716 = vmatprep.subr.mxu1 %v1547_v40  ;;  %v1431_v38 = vunpack.c.h.bf16 %v1581_v32  ;;  %v1588_v40 = vld [vmem:[%s2365_s1 + $0x148] sm:$0xff]  }
  0x36   :  { %435 = vmatmul.mubr.f32.vlgmr.msra.gmra.mxu1 %v37_v41  ;;  %1682 = vmatpush3.msra.mxu0 %v1451_v42  ;;  %v1604_v41 = vld [vmem:[%s2365_s1 + $0x1c8] sm:$0xff]   ;;  %v1462_v42 = vunpack.c.l.bf16 %v1589_v28  ;;  %v1459_v48 = vunpack.c.h.bf16 %v1588_v40 }
  0x37   :  { %1717 = vmatpush3.msra.mxu1 %v1515_v43  ;;  %1683 = vmatprep.subr.mxu0 %v1482_v46  ;;  %v1526_v43 = vunpack.c.l.bf16 %v1605_v29  ;;  %v1430_v46 = vunpack.c.l.bf16 %v1581_v32  ;;  %v1523_v49 = vunpack.c.h.bf16 %v1604_v41 }
  0x38   :  { %1718 = vmatprep.subr.mxu1 %v1546_v47  ;;  %1684 = vmatpush3.msra.mxu0 %v1450_v50  ;;  %v1494_v47 = vunpack.c.l.bf16 %v1597_v33  ;;  %v1427_v50 = vunpack.c.h.bf16 %v1580_v44 }
  0x39   :  { %1719 = vmatpush3.msra.mxu1 %v1514_v51  ;;  %1685 = vmatprep.subr.mxu0 %v1479_v52  ;;  %v1491_v51 = vunpack.c.h.bf16 %v1596_v45  ;;  %v1587_v52 = vld [vmem:[%s2365_s1 + $0x140] sm:$0xff]  }
  0x3a   :  { %1720 = vmatprep.subr.mxu1 %v1543_v53  ;;  %1686 = vmatpush3.msra.mxu0 %v1447_v54  ;;  %v1603_v53 = vld [vmem:[%s2365_s1 + $0x1c0] sm:$0xff]   ;;  %v1458_v54 = vunpack.c.l.bf16 %v1588_v40  ;;  %v1455_v60 = vunpack.c.h.bf16 %v1587_v52 }
  0x3b   :  { %1721 = vmatpush3.msra.mxu1 %v1511_v55  ;;  %1687 = vmatprep.subr.mxu0 %v1478_v58  ;;  %v1522_v55 = vunpack.c.l.bf16 %v1604_v41  ;;  %v1426_v58 = vunpack.c.l.bf16 %v1580_v44  ;;  %v1519_v61 = vunpack.c.h.bf16 %v1603_v53  ;;  %v700_v40 = vld [vmem:[#allocation2 + $0xe0] sm:$0xff]  ;;  %v699_v41 = vld [vmem:[#allocation2 + $0xd0] sm:$0xff] }
  0x3c   :  { %1722 = vmatprep.subr.mxu1 %v1542_v59  ;;  %1688 = vmatpush3.msra.mxu0 %v1446_v62  ;;  %v1490_v59 = vunpack.c.l.bf16 %v1596_v45  ;;  %v1423_v62 = vunpack.c.h.bf16 %v1579_v56  ;;  %v696_v44 = vld [vmem:[#allocation2 + $0xa0] sm:$0xff]  ;;  %v695_v45 = vld [vmem:[#allocation2 + $0x90] sm:$0xff] }
  0x3d   :  { %1723 = vmatpush3.msra.mxu1 %v1510_v63  ;;  %1689 = vmatprep.subr.mxu0 %v1475_v0  ;;  %v1487_v63 = vunpack.c.h.bf16 %v1595_v57  ;;  %v1454_v0 = vunpack.c.l.bf16 %v1587_v52  ;;  %v2159_v52 = vld [vmem:[%s2367_s3 + $0x1e8] sm:$0xff] }
  0x3e   :  { %1724 = vmatprep.subr.mxu1 %v1539_v1  ;;  %1690 = vmatpush3.msra.mxu0 %v1443_v2  ;;  %v1518_v1 = vunpack.c.l.bf16 %v1603_v53  ;;  %v1422_v2 = vunpack.c.l.bf16 %v1579_v56  ;;  %v834_v56 = vld [vmem:[%s2367_s3 + $0x1c0] sm:$0xff] }
  0x3f   :  { %1725 = vmatpush3.msra.mxu1 %v1507_v3  ;;  %1691 = vmatprep.subr.mxu0 %v1474_v6  ;;  %v40_v3 = vld [vmem:[%s2364_s0 + $0x28] sm:$0xff]  ;;  %v39_v6 = vld [vmem:[%s2364_s0 + $0x20] sm:$0xff]  ;;  %v954_v57 = vunpack.c.l.bf16 %v834_v56 }
  0x40   :  { %1726 = vmatprep.subr.mxu1 %v1538_v7  ;;  %1692 = vmatpush3.msra.mxu0 %v1442_v10  ;;  %v41_v7 = vld [vmem:[%s2364_s0 + $0x30] sm:$0xff]  ;;  %v586_v10 = vld [vmem:[#allocation2 + $0x28] sm:$0xff] }
  0x41   :  { %1727 = vmatpush3.msra.mxu1 %v1506_v11  ;;  %1693 = vmatprep.subr.mxu0 %v1471_v12  ;;  %v585_v11 = vld [vmem:[#allocation2 + $0x20] sm:$0xff]  ;;  %v584_v12 = vld [vmem:[#allocation2 + $0x18] sm:$0xff] }
  0x42   :  { %1728 = vmatprep.subr.mxu1 %v1535_v13  ;;  %1694 = vmatpush3.msra.mxu0 %v1439_v14  ;;  %v583_v13 = vld [vmem:[#allocation2 + $0x10] sm:$0xff]  ;;  %v582_v14 = vld [vmem:[#allocation2 + $0x8] sm:$0xff] }
  0x43   :  { %1729 = vmatpush3.msra.mxu1 %v1503_v15  ;;  %1695 = vmatprep.subr.mxu0 %v1470_v18  ;;  %v581_v15 = vld [vmem:[#allocation2] sm:$0xff] }
  0x44   :  { %1730 = vmatprep.subr.mxu1 %v1534_v19  ;;  %1696 = vmatpush3.msra.mxu0 %v1438_v22  ;;  %v704_v18 = vld [vmem:[#allocation2 + $0x120] sm:$0xff] }
  0x45   :  { %1731 = vmatpush3.msra.mxu1 %v1502_v23  ;;  %1697 = vmatprep.subr.mxu0 %v1467_v24  ;;  %v299_v23 = vld [vmem:[#allocation2 + $0x140] ss:$0 sm:$0xff] }
  0x46   :  { %1732 = vmatprep.subr.mxu1 %v1531_v25  ;;  %1698 = vmatpush3.msra.mxu0 %v1435_v26 }
  0x47   :  { %1733 = vmatpush3.msra.mxu1 %v1499_v27  ;;  %1699 = vmatprep.subr.mxu0 %v1466_v30 }
  0x48   :  { %1734 = vmatprep.subr.mxu1 %v1530_v31  ;;  %1700 = vmatpush3.msra.mxu0 %v1434_v34 }
  0x49   :  { %1735 = vmatpush3.msra.mxu1 %v1498_v35  ;;  %1701 = vmatprep.subr.mxu0 %v1463_v36 }
  0x4a   :  { %1736 = vmatprep.subr.mxu1 %v1527_v37  ;;  %1702 = vmatpush3.msra.mxu0 %v1431_v38  ;;  %v703_v37 = vld [vmem:[#allocation2 + $0x110] sm:$0xff]  ;;  %v702_v38 = vld [vmem:[#allocation2 + $0x100] sm:$0xff] }
  0x4b   :  { %1737 = vmatpush3.msra.mxu1 %v1495_v39  ;;  %1703 = vmatprep.subr.mxu0 %v1462_v42  ;;  %v701_v39 = vld [vmem:[#allocation2 + $0xf0] sm:$0xff]  ;;  %v698_v42 = vld [vmem:[#allocation2 + $0xc0] sm:$0xff] }
  0x4c   :  { %1738 = vmatprep.subr.mxu1 %v1526_v43  ;;  %1704 = vmatpush3.msra.mxu0 %v1430_v46  ;;  %v697_v43 = vld [vmem:[#allocation2 + $0xb0] sm:$0xff]  ;;  %v694_v46 = vld [vmem:[#allocation2 + $0x80] sm:$0xff] }
  0x4d   :  { %1739 = vmatpush3.msra.mxu1 %v1494_v47  ;;  %1705 = vmatprep.subr.mxu0 %v1459_v48  ;;  %v693_v47 = vld [vmem:[#allocation2 + $0x70] sm:$0xff]  ;;  %v692_v48 = vld [vmem:[#allocation2 + $0x60] sm:$0xff] }
  0x4e   :  { %1740 = vmatprep.subr.mxu1 %v1523_v49  ;;  %1706 = vmatpush3.msra.mxu0 %v1427_v50  ;;  %v691_v49 = vld [vmem:[#allocation2 + $0x50] sm:$0xff]  ;;  %v690_v50 = vld [vmem:[#allocation2 + $0x40] sm:$0xff] }
  0x4f   :  { %1741 = vmatpush3.msra.mxu1 %v1491_v51  ;;  %1707 = vmatprep.subr.mxu0 %v1458_v54  ;;  %v838_v51 = vld [vmem:[%s2367_s3 + $0x1e0] sm:$0xff] }
  0x50   :  { %1742 = vmatprep.subr.mxu1 %v1522_v55  ;;  %1708 = vmatpush3.msra.mxu0 %v1426_v58  ;;  %v962_v53 = vunpack.c.l.bf16 %v838_v51  ;;  %v963_v54 = vunpack.c.h.bf16 %v838_v51  ;;  %v965_v55 = vunpack.c.h.bf16 %v2159_v52  ;;  %v955_v58 = vunpack.c.h.bf16 %v834_v56 }
  0x51   :  { %1743 = vmatpush3.msra.mxu1 %v1490_v59  ;;  %1709 = vmatprep.subr.mxu0 %v1455_v60  ;;  %v830_v59 = vld [vmem:[%s2367_s3 + $0x1a0] sm:$0xff]  ;;  %v964_v51 = vunpack.c.l.bf16 %v2159_v52  ;;  %v823_v52 = vld [vmem:[%s2367_s3 + $0x168] sm:$0xff] }
  0x52   :  { %1744 = vmatprep.subr.mxu1 %v1519_v61  ;;  %1710 = vmatpush3.msra.mxu0 %v1423_v62  ;;  %v946_v60 = vunpack.c.l.bf16 %v830_v59  ;;  %v947_v61 = vunpack.c.h.bf16 %v830_v59  ;;  %v826_v62 = vld [vmem:[%s2367_s3 + $0x180] sm:$0xff] }
  0x53   :  { %1745 = vmatpush3.msra.mxu1 %v1487_v63  ;;  %1711 = vmatprep.subr.mxu0 %v1454_v0  ;;  %v938_v63 = vunpack.c.l.bf16 %v826_v62  ;;  %v939_v0 = vunpack.c.h.bf16 %v826_v62  ;;  %v819_v62 = vld [vmem:[%s2367_s3 + $0x148] sm:$0xff] }
  0x54   :  { %1746 = vmatprep.subr.mxu1 %v1518_v1  ;;  %1712 = vmatpush3.msra.mxu0 %v1422_v2  ;;  %v822_v1 = vld [vmem:[%s2367_s3 + $0x160] sm:$0xff] }
  0x55   :  { %504 = vmatprep.mubr.f32.mxu0 %v40_v3  ;;  %1747 = vmatpush3.msra.mxu1 %v1486_v4  ;;  %v930_v2 = vunpack.c.l.bf16 %v822_v1  ;;  %v931_v3 = vunpack.c.h.bf16 %v822_v1  ;;  %v818_v4 = vld [vmem:[%s2367_s3 + $0x140] sm:$0xff]  ;;  %v815_v1 = vld [vmem:[%s2367_s3 + $0x128] sm:$0xff] }
  0x56   :  { %574 = vmatprep.mubr.f32.mxu1 %v42_v5  ;;  %505 = vmatmul.mubr.f32.vlgmr.msra.gmra.mxu0 %v39_v6  ;;  %v922_v5 = vunpack.c.l.bf16 %v818_v4  ;;  %v923_v6 = vunpack.c.h.bf16 %v818_v4  ;;  %v811_v4 = vld [vmem:[%s2367_s3 + $0x108] sm:$0xff] }
  0x57   :  { %575 = vmatmul.mubr.f32.vlgmr.msra.gmra.mxu1 %v41_v7  ;;  %630 = vmatprep.subr.mxu0 %v588_v8  ;;  %v814_v7 = vld [vmem:[%s2367_s3 + $0x120] sm:$0xff] }
  0x58   :  { %631 = vmatpush1.msra.mxu0 %v587_v9  ;;  %670 = vmatprep.mubr.f32.mxu0 %v1881_v16  ;;  %v914_v8 = vunpack.c.l.bf16 %v814_v7  ;;  %v915_v9 = vunpack.c.h.bf16 %v814_v7  ;;  %v807_v7 = vld [vmem:[%s2367_s3 + $0xe8] sm:$0xff] }
  0x59   :  { %632 = vmatprep.subr.mxu0 %v586_v10  ;;  %1768 = vmatprep.subr.mxu1 %v1881_v16  ;;  %v810_v10 = vld [vmem:[%s2367_s3 + $0x100] sm:$0xff] }
  0x5a   :  { %633 = vmatpush1.msra.mxu0 %v585_v11  ;;  %1769 = vmatpush3.msra.mxu1 %v705_v17  ;;  %v906_v11 = vunpack.c.l.bf16 %v810_v10  ;;  %v802_v17 = vld [vmem:[%s2367_s3 + $0xc0] sm:$0xff] }
  0x5b   :  { %634 = vmatprep.subr.mxu0 %v584_v12  ;;  %1770 = vmatprep.subr.mxu1 %v1881_v16  ;;  %v907_v12 = vunpack.c.h.bf16 %v810_v10  ;;  %v803_v10 = vld [vmem:[%s2367_s3 + $0xc8] sm:$0xff] }
  0x5c   :  { %635 = vmatpush1.msra.mxu0 %v583_v13  ;;  %1771 = vmatpush3.msra.mxu1 %v704_v18  ;;  %v806_v13 = vld [vmem:[%s2367_s3 + $0xe0] sm:$0xff]  ;;  %v890_v18 = vunpack.c.l.bf16 %v802_v17 }
  0x5d   :  { %636 = vmatprep.subr.mxu0 %v582_v14  ;;  %1772 = vmatprep.subr.mxu1 %v1881_v16  ;;  %v898_v14 = vunpack.c.l.bf16 %v806_v13 }
  0x5e   :  { %637 = vmatpush1.msra.mxu0 %v581_v15  ;;  %1773 = vmatpush3.msra.mxu1 %v703_v37  ;;  %v899_v15 = vunpack.c.h.bf16 %v806_v13  ;;  %v799_v13 = vld [vmem:[%s2367_s3 + $0xa8] sm:$0xff] }
  0x5f   :  { %1774 = vmatprep.subr.mxu1 %v1881_v16  ;;  %1800 = vmatprep.mubr.msk.f32.mxu1 %vm1882_vm1, %v1881_v16 }
  0x60   :  { %1775 = vmatpush3.msra.mxu1 %v702_v38  ;;  %970 = vmatprep.subr.mxu0 %v963_v54 }
  0x61   :  { %1776 = vmatprep.subr.mxu1 %v1881_v16 }
  0x62   :  { %1777 = vmatpush3.msra.mxu1 %v701_v39 }
  0x63   :  { %1778 = vmatprep.subr.mxu1 %v1881_v16 }
  0x64   :  { %1779 = vmatpush3.msra.mxu1 %v700_v40 }
  0x65   :  { %1780 = vmatprep.subr.mxu1 %v1881_v16 }
  0x66   :  { %1781 = vmatpush3.msra.mxu1 %v699_v41 }
  0x67   :  { %1782 = vmatprep.subr.mxu1 %v1881_v16 }
  0x68   :  { %1783 = vmatpush3.msra.mxu1 %v698_v42 }
  0x69   :  { %1784 = vmatprep.subr.mxu1 %v1881_v16 }
  0x6a   :  { %1785 = vmatpush3.msra.mxu1 %v697_v43 }
  0x6b   :  { %1786 = vmatprep.subr.mxu1 %v1881_v16 }
  0x6c   :  { %1787 = vmatpush3.msra.mxu1 %v696_v44 }
  0x6d   :  { %1788 = vmatprep.subr.mxu1 %v1881_v16 }
  0x6e   :  { %1789 = vmatpush3.msra.mxu1 %v695_v45  ;;  %v682_v45 = vld [vmem:[#allocation2 + $0x170] sm:$0xff] }
  0x6f   :  { %1790 = vmatprep.subr.mxu1 %v1881_v16 }
  0x70   :  { %1791 = vmatpush3.msra.mxu1 %v694_v46 }
  0x71   :  { %1792 = vmatprep.subr.mxu1 %v1881_v16 }
  0x72   :  { %1793 = vmatpush3.msra.mxu1 %v693_v47 }
  0x73   :  { %1794 = vmatprep.subr.mxu1 %v1881_v16 }
  0x74   :  { %1795 = vmatpush3.msra.mxu1 %v692_v48  ;;  %v835_v48 = vld [vmem:[%s2367_s3 + $0x1c8] sm:$0xff] }
  0x75   :  { %1796 = vmatprep.subr.mxu1 %v1881_v16  ;;  %v956_v56 = vunpack.c.l.bf16 %v835_v48 }
  0x76   :  { %1797 = vmatpush3.msra.mxu1 %v691_v49 }
  0x77   :  { %1798 = vmatprep.subr.mxu1 %v1881_v16 }
  0x78   :  { %1799 = vmatpush3.msra.mxu1 %v690_v50 }
  0x79   :  { %1041 = vmatprep.subr.mxu1 %v965_v55  ;;  %v957_v55 = vunpack.c.h.bf16 %v835_v48 }
  0xf4   :  { %v1643_v19 = vpop.f32.mrf.mxu0 }
  0xf6   :  { %v1678_v20 = vpop.f32.mrf.mxu1  ;;  %v1644_v21 = vpop.f32.mrf.mxu0 }
  0xf7   :  { %v1645_v22 = vadd.f32 %v1644_v21, %v1643_v19  ;;  %v891_v19 = vunpack.c.h.bf16 %v802_v17  ;;  %v795_v17 = vld [vmem:[%s2367_s3 + $0x88] sm:$0xff] }
  0xf8   :  { %v1679_v24 = vpop.f32.mrf.mxu1 }
  0xf9   :  { %v367_v25 = vadd.f32 %v1645_v22, %v299_v23  ;;  %v1680_v26 = vadd.f32 %v1679_v24, %v1678_v20  ;;  %v798_v20 = vld [vmem:[%s2367_s3 + $0xa0] sm:$0xff] }
  0xfa   :  { %v882_v21 = vunpack.c.l.bf16 %v798_v20  ;;  %v883_v22 = vunpack.c.h.bf16 %v798_v20  ;;  %v794_v23 = vld [vmem:[%s2367_s3 + $0x80] sm:$0xff]  ;;  %v791_v20 = vld [vmem:[%s2367_s3 + $0x68] sm:$0xff] }
  0xfb   :  { %v437_v31 = vadd.f32 %v1680_v26, %v367_v25  ;;  %v874_v24 = vunpack.c.l.bf16 %v794_v23  ;;  %v875_v25 = vunpack.c.h.bf16 %v794_v23  ;;  %v790_v26 = vld [vmem:[%s2367_s3 + $0x60] sm:$0xff]  ;;  %v787_v23 = vld [vmem:[%s2367_s3 + $0x48] sm:$0xff] }
 0x116   :  { %v1713_v27 = vpop.f32.mrf.mxu0 }
 0x117   :  { %v1748_v28 = vpop.f32.mrf.mxu1 }
 0x118   :  { %v1714_v29 = vpop.f32.mrf.mxu0 }
 0x119   :  { %v1749_v30 = vpop.f32.mrf.mxu1  ;;  %v1715_v32 = vadd.f32 %v1714_v29, %v1713_v27  ;;  %v866_v27 = vunpack.c.l.bf16 %v790_v26  ;;  %v786_v29 = vld [vmem:[%s2367_s3 + $0x40] sm:$0xff] }
 0x11a   :  { %v1750_v34 = vadd.f32 %v1749_v30, %v1748_v28  ;;  %v867_v28 = vunpack.c.h.bf16 %v790_v26  ;;  %v858_v30 = vunpack.c.l.bf16 %v786_v29  ;;  %v861_v26 = vunpack.c.h.bf16 %v787_v23 }
 0x11b   :  { %v507_v33 = vadd.f32 %v1715_v32, %v437_v31  ;;  %v859_v31 = vunpack.c.h.bf16 %v786_v29  ;;  %v592_v32 = vlaneseq  ;;  %v783_v29 = vld [vmem:[%s2367_s3 + $0x28] sm:$0xff] }
 0x11d   :  { %v577_v35 = vadd.f32 %v1750_v34, %v507_v33  ;;  %v593_v33 = vshrl.u32 %v592_v32, 7  ;;  %v678_v42 = vand.u32 127, %v592_v32 }
 0x11f   :  { %v580_v36 = vmax.f32 %v577_v35, 0.0  ;;  %v598_v34 = vsub.s32 1, %v593_v33  ;;  %v590_v35 = vld [vmem:[#allocation2 + $0x150] ss:$8 sm:$0x3]  ;;  %v594_v43 = vsub.s32 0, %v593_v33  ;;  %v852_v33 = vunpack.c.l.bf16 %v783_v29 }
 0x120   :  { %vm679_vm2 = vcmp.ge.s32.totalorder %v678_v42, 16  ;;  %vm680_vm3 = vcmp.lt.s32.totalorder %v678_v42, 24 }
 0x121   :  { %1291 = vmatmul.mubr.msk.f32.vlgmr.msra.gmra.mxu0 %vm602_vm0, %v580_v36  ;;  %v599_v36 = vrot.slane %v590_v35, %v598_v34  ;;  %v595_v44 = vrot.slane %v590_v35, %v594_v43  ;;  %vm681_vm4 = vmand %vm679_vm2, %vm680_vm3  ;;  %v778_v34 = vld [vmem:[%s2367_s3] sm:$0xff]  ;;  %v779_v35 = vld [vmem:[%s2367_s3 + $0x8] sm:$0xff] }
 0x122   :  { %1034 = vmatprep.mubr.f32.mxu0 %v1881_v16  ;;  %971 = vmatpush1.msra.mxu0 %v962_v53  ;;  %v831_v53 = vld [vmem:[%s2367_s3 + $0x1a8] sm:$0xff] }
 0x123   :  { %972 = vmatprep.subr.mxu0 %v955_v58  ;;  %v949_v58 = vunpack.c.h.bf16 %v831_v53  ;;  %v948_v59 = vunpack.c.l.bf16 %v831_v53  ;;  %v832_v53 = vld [vmem:[%s2367_s3 + $0x1b0] sm:$0xff] }
 0x124   :  { %973 = vmatpush1.msra.mxu0 %v954_v57  ;;  %v827_v57 = vld [vmem:[%s2367_s3 + $0x188] sm:$0xff] }
 0x125   :  { %974 = vmatprep.subr.mxu0 %v947_v61  ;;  %v940_v61 = vunpack.c.l.bf16 %v827_v57 }
 0x126   :  { %975 = vmatpush1.msra.mxu0 %v946_v60  ;;  %v941_v60 = vunpack.c.h.bf16 %v827_v57 }
 0x127   :  { %976 = vmatprep.subr.mxu0 %v939_v0  ;;  %v932_v0 = vunpack.c.l.bf16 %v823_v52 }
 0x128   :  { %977 = vmatpush1.msra.mxu0 %v938_v63  ;;  %v933_v63 = vunpack.c.h.bf16 %v823_v52  ;;  %v828_v52 = vld [vmem:[%s2367_s3 + $0x190] sm:$0xff] }
 0x129   :  { %978 = vmatprep.subr.mxu0 %v931_v3  ;;  %v924_v3 = vunpack.c.l.bf16 %v819_v62 }
 0x12a   :  { %979 = vmatpush1.msra.mxu0 %v930_v2  ;;  %v925_v2 = vunpack.c.h.bf16 %v819_v62 }
 0x12b   :  { %980 = vmatprep.subr.mxu0 %v923_v6  ;;  %v916_v6 = vunpack.c.l.bf16 %v815_v1 }
 0x12c   :  { %981 = vmatpush1.msra.mxu0 %v922_v5  ;;  %v917_v5 = vunpack.c.h.bf16 %v815_v1  ;;  %v824_v1 = vld [vmem:[%s2367_s3 + $0x170] sm:$0xff] }
 0x12d   :  { %982 = vmatprep.subr.mxu0 %v915_v9  ;;  %v908_v9 = vunpack.c.l.bf16 %v811_v4 }
 0x12e   :  { %983 = vmatpush1.msra.mxu0 %v914_v8  ;;  %v909_v8 = vunpack.c.h.bf16 %v811_v4 }
 0x12f   :  { %984 = vmatprep.subr.mxu0 %v907_v12  ;;  %v900_v12 = vunpack.c.l.bf16 %v807_v7 }
 0x130   :  { %985 = vmatpush1.msra.mxu0 %v906_v11  ;;  %v901_v11 = vunpack.c.h.bf16 %v807_v7  ;;  %v820_v7 = vld [vmem:[%s2367_s3 + $0x150] sm:$0xff] }
 0x131   :  { %986 = vmatprep.subr.mxu0 %v899_v15  ;;  %v892_v15 = vunpack.c.l.bf16 %v803_v10 }
 0x132   :  { %987 = vmatpush1.msra.mxu0 %v898_v14  ;;  %v893_v14 = vunpack.c.h.bf16 %v803_v10 }
 0x133   :  { %988 = vmatprep.subr.mxu0 %v891_v19  ;;  %v884_v19 = vunpack.c.l.bf16 %v799_v13 }
 0x134   :  { %989 = vmatpush1.msra.mxu0 %v890_v18  ;;  %v885_v18 = vunpack.c.h.bf16 %v799_v13  ;;  %v816_v13 = vld [vmem:[%s2367_s3 + $0x130] sm:$0xff] }
 0x135   :  { %990 = vmatprep.subr.mxu0 %v883_v22  ;;  %v876_v22 = vunpack.c.l.bf16 %v795_v17 }
 0x136   :  { %991 = vmatpush1.msra.mxu0 %v882_v21  ;;  %v877_v21 = vunpack.c.h.bf16 %v795_v17 }
 0x137   :  { %992 = vmatprep.subr.mxu0 %v875_v25  ;;  %v868_v25 = vunpack.c.l.bf16 %v791_v20 }
 0x138   :  { %993 = vmatpush1.msra.mxu0 %v874_v24  ;;  %v869_v24 = vunpack.c.h.bf16 %v791_v20  ;;  %v812_v20 = vld [vmem:[%s2367_s3 + $0x110] sm:$0xff] }
 0x139   :  { %994 = vmatprep.subr.mxu0 %v867_v28  ;;  %v782_v28 = vld [vmem:[%s2367_s3 + $0x20] sm:$0xff] }
 0x13a   :  { %995 = vmatpush1.msra.mxu0 %v866_v27  ;;  %v860_v27 = vunpack.c.l.bf16 %v787_v23  ;;  %v850_v32 = vunpack.c.l.bf16 %v782_v28 }
 0x13b   :  { %996 = vmatprep.subr.mxu0 %v859_v31  ;;  %v853_v31 = vunpack.c.h.bf16 %v783_v29 }
 0x13c   :  { %997 = vmatpush1.msra.mxu0 %v858_v30  ;;  %v851_v30 = vunpack.c.h.bf16 %v782_v28  ;;  %v911_v28 = vunpack.c.h.bf16 %v812_v20 }
 0x13e   :  { %998 = vmatprep.subr.mxu0 %v851_v30  ;;  %v910_v30 = vunpack.c.l.bf16 %v812_v20 }
 0x13f   :  { %999 = vmatpush1.msra.mxu0 %v850_v32  ;;  %v804_v32 = vld [vmem:[%s2367_s3 + $0xd0] sm:$0xff] }
 0x1e1   :  { %v672_v37 = vpop.f32.mrf.mxu0 }
 0x1e2   :  { %v673_v49 = vadd.f32 %v672_v37, %v595_v44  ;;  %v845_v37 = vunpack.c.h.bf16 %v779_v35  ;;  %v706_v44 = vld [vmem:[#allocation2 + $0x160] ss:$0 sm:$0xff] }
 0x1e3   :  { %v674_v38 = vpop.f32.mrf.mxu0 }
 0x1e4   :  { %v675_v39 = vadd.f32 %v674_v38, %v599_v36  ;;  %v843_v36 = vunpack.c.h.bf16 %v778_v34  ;;  %v842_v38 = vunpack.c.l.bf16 %v778_v34 }
 0x1e6   :  { %v683_v40 = vmul.f32 0.5, %v675_v39  ;;  %v844_v39 = vunpack.c.l.bf16 %v779_v35  ;;  %1000 = vmatprep.subr.mxu0 %v843_v36 }
 0x1e7   :  { %1001 = vmatpush1.msra.mxu0 %v842_v38  ;;  %v800_v38 = vld [vmem:[%s2367_s3 + $0xb0] sm:$0xff] }
 0x1e8   :  { %v684_v41 = vmul.f32 1.442695, %v683_v40  ;;  %v840_v40 = vld [vmem:[%s2367_s3 + $0x1f0] sm:$0xff] }
 0x1e9   :  { %v967_v42 = vunpack.c.h.bf16 %v840_v40 }
 0x1ea   :  { %1810 = vpow2.f32 %v684_v41  ;;  %v841_v41 = vld [vmem:[%s2367_s3 + $0x1f8] sm:$0xff] }
 0x1eb   :  { %v969_v43 = vunpack.c.h.bf16 %v841_v41  ;;  %1112 = vmatprep.subr.mxu0 %v967_v42  ;;  %v894_v42 = vunpack.c.l.bf16 %v804_v32 }
 0x1f7   :  { %v1811_v46 = vpop.eup %1810 }
 0x1f8   :  { %v686_v47 = vmul.f32 %v1811_v46, %v682_v45  ;;  %v836_v46 = vld [vmem:[%s2367_s3 + $0x1d0] sm:$0xff] }
 0x1fa   :  { %v687_v50 = vsel %vm681_vm4, %v686_v47, 0.0  ;;  %v837_v47 = vld [vmem:[%s2367_s3 + $0x1d8] sm:$0xff] }
 0x1fb   :  { %v688_v54 = vadd.f32 %v687_v50, %v673_v49  ;;  %v966_v50 = vunpack.c.l.bf16 %v840_v40  ;;  %v961_v57 = vunpack.c.h.bf16 %v837_v47  ;;  %v895_v40 = vunpack.c.h.bf16 %v804_v32 }
 0x1fd   :  { %1801 = vmatmul.mubr.f32.vlgmr.msra.gmra.mxu1 %v688_v54  ;;  %689 = vst [vmem:[#allocation6] sm:$0xff] %v688_v54  ;;  %v833_v54 = vld [vmem:[%s2367_s3 + $0x1b8] sm:$0xff] }
 0x1fe   :  { %1042 = vmatpush1.msra.mxu1 %v964_v51  ;;  %1105 = vmatprep.mubr.f32.mxu1 %v1881_v16  ;;  %v968_v51 = vunpack.c.l.bf16 %v841_v41  ;;  %v953_v62 = vunpack.c.h.bf16 %v833_v54 }
 0x1ff   :  { %1043 = vmatprep.subr.mxu1 %v957_v55 }
 0x200   :  { %1044 = vmatpush1.msra.mxu1 %v956_v56  ;;  %v959_v56 = vunpack.c.h.bf16 %v836_v46 }
 0x201   :  { %1045 = vmatprep.subr.mxu1 %v949_v58  ;;  %v958_v58 = vunpack.c.l.bf16 %v836_v46  ;;  %v887_v46 = vunpack.c.h.bf16 %v800_v38 }
 0x202   :  { %1046 = vmatpush1.msra.mxu1 %v948_v59  ;;  %v960_v59 = vunpack.c.l.bf16 %v837_v47 }
 0x203   :  { %1047 = vmatprep.subr.mxu1 %v941_v60  ;;  %v829_v60 = vld [vmem:[%s2367_s3 + $0x198] sm:$0xff] }
 0x204   :  { %1048 = vmatpush1.msra.mxu1 %v940_v61  ;;  %v951_v61 = vunpack.c.h.bf16 %v832_v53  ;;  %v945_v4 = vunpack.c.h.bf16 %v829_v60 }
 0x205   :  { %1049 = vmatprep.subr.mxu1 %v933_v63  ;;  %v950_v63 = vunpack.c.l.bf16 %v832_v53 }
 0x206   :  { %1050 = vmatpush1.msra.mxu1 %v932_v0  ;;  %v952_v0 = vunpack.c.l.bf16 %v833_v54 }
 0x207   :  { %1051 = vmatprep.subr.mxu1 %v925_v2  ;;  %v825_v2 = vld [vmem:[%s2367_s3 + $0x178] sm:$0xff] }
 0x208   :  { %1052 = vmatpush1.msra.mxu1 %v924_v3  ;;  %v943_v3 = vunpack.c.h.bf16 %v828_v52  ;;  %v937_v10 = vunpack.c.h.bf16 %v825_v2 }
 0x209   :  { %1053 = vmatprep.subr.mxu1 %v917_v5  ;;  %v942_v5 = vunpack.c.l.bf16 %v828_v52 }
 0x20a   :  { %1054 = vmatpush1.msra.mxu1 %v916_v6  ;;  %v944_v6 = vunpack.c.l.bf16 %v829_v60 }
 0x20b   :  { %1055 = vmatprep.subr.mxu1 %v909_v8  ;;  %v821_v8 = vld [vmem:[%s2367_s3 + $0x158] sm:$0xff] }
 0x20c   :  { %1056 = vmatpush1.msra.mxu1 %v908_v9  ;;  %v935_v9 = vunpack.c.h.bf16 %v824_v1  ;;  %v929_v17 = vunpack.c.h.bf16 %v821_v8 }
 0x20d   :  { %1057 = vmatprep.subr.mxu1 %v901_v11  ;;  %v934_v11 = vunpack.c.l.bf16 %v824_v1 }
 0x20e   :  { %1058 = vmatpush1.msra.mxu1 %v900_v12  ;;  %v936_v12 = vunpack.c.l.bf16 %v825_v2 }
 0x20f   :  { %1059 = vmatprep.subr.mxu1 %v893_v14  ;;  %v817_v14 = vld [vmem:[%s2367_s3 + $0x138] sm:$0xff] }
 0x210   :  { %1060 = vmatpush1.msra.mxu1 %v892_v15  ;;  %v927_v15 = vunpack.c.h.bf16 %v820_v7  ;;  %v921_v23 = vunpack.c.h.bf16 %v817_v14 }
 0x211   :  { %1061 = vmatprep.subr.mxu1 %v885_v18  ;;  %v926_v18 = vunpack.c.l.bf16 %v820_v7 }
 0x212   :  { %1062 = vmatpush1.msra.mxu1 %v884_v19  ;;  %v928_v19 = vunpack.c.l.bf16 %v821_v8 }
 0x213   :  { %1063 = vmatprep.subr.mxu1 %v877_v21  ;;  %v813_v21 = vld [vmem:[%s2367_s3 + $0x118] sm:$0xff] }
 0x214   :  { %1064 = vmatpush1.msra.mxu1 %v876_v22  ;;  %v919_v22 = vunpack.c.h.bf16 %v816_v13  ;;  %v913_v29 = vunpack.c.h.bf16 %v813_v21 }
 0x215   :  { %1065 = vmatprep.subr.mxu1 %v869_v24  ;;  %v918_v24 = vunpack.c.l.bf16 %v816_v13 }
 0x216   :  { %1066 = vmatpush1.msra.mxu1 %v868_v25  ;;  %v920_v25 = vunpack.c.l.bf16 %v817_v14 }
 0x217   :  { %1067 = vmatprep.subr.mxu1 %v861_v26  ;;  %v808_v26 = vld [vmem:[%s2367_s3 + $0xf0] sm:$0xff] }
 0x218   :  { %1068 = vmatpush1.msra.mxu1 %v860_v27  ;;  %v809_v27 = vld [vmem:[%s2367_s3 + $0xf8] sm:$0xff]  ;;  %v903_v34 = vunpack.c.h.bf16 %v808_v26  ;;  %v902_v36 = vunpack.c.l.bf16 %v808_v26 }
 0x219   :  { %1069 = vmatprep.subr.mxu1 %v853_v31  ;;  %v912_v31 = vunpack.c.l.bf16 %v813_v21  ;;  %v905_v35 = vunpack.c.h.bf16 %v809_v27 }
 0x21a   :  { %1070 = vmatpush1.msra.mxu1 %v852_v33  ;;  %v805_v33 = vld [vmem:[%s2367_s3 + $0xd8] sm:$0xff] }
 0x21b   :  { %1071 = vmatprep.subr.mxu1 %v845_v37  ;;  %v904_v37 = vunpack.c.l.bf16 %v809_v27  ;;  %v897_v41 = vunpack.c.h.bf16 %v805_v33 }
 0x21c   :  { %1072 = vmatpush1.msra.mxu1 %v844_v39  ;;  %v801_v39 = vld [vmem:[%s2367_s3 + $0xb8] sm:$0xff] }
 0x21d   :  { %1183 = vmatprep.subr.mxu1 %v969_v43  ;;  %v896_v43 = vunpack.c.l.bf16 %v805_v33  ;;  %v889_v47 = vunpack.c.h.bf16 %v801_v39 }
 0x2bd   :  { %v773_v45 = vpop.f32.mrf.mxu1 }
 0x2be   :  { %v774_v48 = vadd.f32 %v773_v45, %v706_v44  ;;  %v796_v44 = vld [vmem:[%s2367_s3 + $0x90] sm:$0xff]  ;;  %v797_v45 = vld [vmem:[%s2367_s3 + $0x98] sm:$0xff] }
 0x2bf   :  { %v1802_v49 = vpop.f32.mrf.mxu1  ;;  %v879_v53 = vunpack.c.h.bf16 %v796_v44  ;;  %v881_v54 = vunpack.c.h.bf16 %v797_v45 }
 0x2c0   :  { %v2272_v55 = vmax.f32 %v774_v48, 0.0  ;;  %v886_v48 = vunpack.c.l.bf16 %v800_v38  ;;  %v888_v49 = vunpack.c.l.bf16 %v801_v39 }
 0x2c2   :  { %1035 = vmatmul.mubr.f32.vlgmr.msra.gmra.mxu0 %v2272_v55  ;;  %1106 = vmatmul.mubr.f32.vlgmr.msra.gmra.mxu1 %v2272_v55 }
 0x2c3   :  { %1113 = vmatpush1.msra.mxu0 %v966_v50  ;;  %1184 = vmatpush1.msra.mxu1 %v968_v51  ;;  %v792_v50 = vld [vmem:[%s2367_s3 + $0x70] sm:$0xff]  ;;  %v793_v51 = vld [vmem:[%s2367_s3 + $0x78] sm:$0xff] }
 0x2c4   :  { %1114 = vmatprep.subr.mxu0 %v959_v56  ;;  %1185 = vmatprep.subr.mxu1 %v961_v57  ;;  %v878_v56 = vunpack.c.l.bf16 %v796_v44  ;;  %v880_v57 = vunpack.c.l.bf16 %v797_v45  ;;  %v871_v52 = vunpack.c.h.bf16 %v792_v50  ;;  %v873_v60 = vunpack.c.h.bf16 %v793_v51 }
 0x2c5   :  { %1115 = vmatpush1.msra.mxu0 %v958_v58  ;;  %1186 = vmatpush1.msra.mxu1 %v960_v59  ;;  %v788_v58 = vld [vmem:[%s2367_s3 + $0x50] sm:$0xff]  ;;  %v789_v59 = vld [vmem:[%s2367_s3 + $0x58] sm:$0xff] }
 0x2c6   :  { %1116 = vmatprep.subr.mxu0 %v951_v61  ;;  %1187 = vmatprep.subr.mxu1 %v953_v62  ;;  %v870_v61 = vunpack.c.l.bf16 %v792_v50  ;;  %v872_v62 = vunpack.c.l.bf16 %v793_v51  ;;  %v863_v1 = vunpack.c.h.bf16 %v788_v58  ;;  %v865_v2 = vunpack.c.h.bf16 %v789_v59 }
 0x2c7   :  { %1117 = vmatpush1.msra.mxu0 %v950_v63  ;;  %1188 = vmatpush1.msra.mxu1 %v952_v0  ;;  %v784_v63 = vld [vmem:[%s2367_s3 + $0x30] sm:$0xff]  ;;  %v785_v0 = vld [vmem:[%s2367_s3 + $0x38] sm:$0xff] }
 0x2c8   :  { %1118 = vmatprep.subr.mxu0 %v943_v3  ;;  %1189 = vmatprep.subr.mxu1 %v945_v4  ;;  %v862_v3 = vunpack.c.l.bf16 %v788_v58  ;;  %v864_v4 = vunpack.c.l.bf16 %v789_v59  ;;  %v855_v7 = vunpack.c.h.bf16 %v784_v63  ;;  %v857_v8 = vunpack.c.h.bf16 %v785_v0 }
 0x2c9   :  { %1119 = vmatpush1.msra.mxu0 %v942_v5  ;;  %1190 = vmatpush1.msra.mxu1 %v944_v6  ;;  %v780_v5 = vld [vmem:[%s2367_s3 + $0x10] sm:$0xff]  ;;  %v781_v6 = vld [vmem:[%s2367_s3 + $0x18] sm:$0xff]  ;;  %s1883_s3 = smov [#allocation6]  }
 0x2ca   :  { %1120 = vmatprep.subr.mxu0 %v935_v9  ;;  %1191 = vmatprep.subr.mxu1 %v937_v10  ;;  %v854_v9 = vunpack.c.l.bf16 %v784_v63  ;;  %v856_v10 = vunpack.c.l.bf16 %v785_v0  ;;  %v846_v13 = vunpack.c.l.bf16 %v780_v5  ;;  %v848_v14 = vunpack.c.l.bf16 %v781_v6  ;;  %s1278_s27 = sshll.u32 %s1883_s3, 4  ;;  %s1279_s27 = int_to_ptr.vmem [resolvable:$true] %s1278_s27 }
 0x2cb   :  { %1121 = vmatpush1.msra.mxu0 %v934_v11  ;;  %1192 = vmatpush1.msra.mxu1 %v936_v12  ;;  %v847_v11 = vunpack.c.h.bf16 %v780_v5  ;;  %v849_v12 = vunpack.c.h.bf16 %v781_v6  ;;  %s1832_s28 = scalar_lea.vmem %s1279_s27, 128  ;;  %p1837_p6 = scmp.lt.s32.totalorder %s1279_s27, %s1279_s27 }
 0x2cc   :  { %1122 = vmatprep.subr.mxu0 %v927_v15  ;;  %1193 = vmatprep.subr.mxu1 %v929_v17  ;;  %p1833_p5 = scmp.ne.s32.totalorder %s1279_s27, %s1832_s28  ;;  %p1838_p7 = scmp.lt.s32.totalorder %s1832_s28, %s1832_s28 }
 0x2cd   :  { %1123 = vmatpush1.msra.mxu0 %v926_v18  ;;  %1194 = vmatpush1.msra.mxu1 %v928_v19 }
 0x2ce   :  { %1124 = vmatprep.subr.mxu0 %v919_v22  ;;  %1195 = vmatprep.subr.mxu1 %v921_v23  ;;  %p1839_p8 = por %p1838_p7, %p1837_p6 }
 0x2cf   :  { %1125 = vmatpush1.msra.mxu0 %v918_v24  ;;  %1196 = vmatpush1.msra.mxu1 %v920_v25 }
 0x2d0   :  { %1126 = vmatprep.subr.mxu0 %v911_v28  ;;  %1197 = vmatprep.subr.mxu1 %v913_v29  ;;  %p1840_p9 = pnand %p1839_p8, %p1833_p5 }
 0x2d1   :  { %1127 = vmatpush1.msra.mxu0 %v910_v30  ;;  %1198 = vmatpush1.msra.mxu1 %v912_v31 }
 0x2d2   :  { %1128 = vmatprep.subr.mxu0 %v903_v34  ;;  %1199 = vmatprep.subr.mxu1 %v905_v35 }
 0x2d3   :  { %1129 = vmatpush1.msra.mxu0 %v902_v36  ;;  %1200 = vmatpush1.msra.mxu1 %v904_v37 }
 0x2d4   :  { %1130 = vmatprep.subr.mxu0 %v895_v40  ;;  %1201 = vmatprep.subr.mxu1 %v897_v41 }
 0x2d5   :  { %1131 = vmatpush1.msra.mxu0 %v894_v42  ;;  %1202 = vmatpush1.msra.mxu1 %v896_v43 }
 0x2d6   :  { %1132 = vmatprep.subr.mxu0 %v887_v46  ;;  %1203 = vmatprep.subr.mxu1 %v889_v47 }
 0x2d7   :  { %1133 = vmatpush1.msra.mxu0 %v886_v48  ;;  %1204 = vmatpush1.msra.mxu1 %v888_v49 }
 0x2d8   :  { %1134 = vmatprep.subr.mxu0 %v879_v53  ;;  %1205 = vmatprep.subr.mxu1 %v881_v54 }
 0x2d9   :  { %1135 = vmatpush1.msra.mxu0 %v878_v56  ;;  %1206 = vmatpush1.msra.mxu1 %v880_v57 }
 0x2da   :  { %1136 = vmatprep.subr.mxu0 %v871_v52  ;;  %1207 = vmatprep.subr.mxu1 %v873_v60 }
 0x2db   :  { %1137 = vmatpush1.msra.mxu0 %v870_v61  ;;  %1208 = vmatpush1.msra.mxu1 %v872_v62 }
 0x2dc   :  { %1138 = vmatprep.subr.mxu0 %v863_v1  ;;  %1209 = vmatprep.subr.mxu1 %v865_v2 }
 0x2dd   :  { %1139 = vmatpush1.msra.mxu0 %v862_v3  ;;  %1210 = vmatpush1.msra.mxu1 %v864_v4 }
 0x2de   :  { %1140 = vmatprep.subr.mxu0 %v855_v7  ;;  %1211 = vmatprep.subr.mxu1 %v857_v8 }
 0x2df   :  { %1141 = vmatpush1.msra.mxu0 %v854_v9  ;;  %1212 = vmatpush1.msra.mxu1 %v856_v10 }
 0x2e0   :  { %1142 = vmatprep.subr.mxu0 %v847_v11  ;;  %1213 = vmatprep.subr.mxu1 %v849_v12 }
 0x2e1   :  { %1143 = vmatpush1.msra.mxu0 %v846_v13  ;;  %1176 = vmatprep.mubr.f32.mxu0 %v1881_v16 }
 0x2e2   :  { %1214 = vmatpush1.msra.mxu1 %v848_v14  ;;  %1247 = vmatprep.mubr.f32.mxu1 %v1881_v16 }
 0x2e3   :  { %1177 = vmatmul.mubr.f32.vlgmr.msra.gmra.mxu0 %v2272_v55  ;;  %1248 = vmatmul.mubr.f32.vlgmr.msra.gmra.mxu1 %v2272_v55 }
 0x2e4   :  { %1843 = shalt.err (!%p1840_p9)
}
 0x2e5   :  { %1281 = dma.vmem_to_hbm [thread:$0]  %s1279_s27, 128, %s2369_s5, [#allocation7]  }
 0x2e6   :  { %s1884_s1 = smov [#allocation5]  }
 0x2e7   :  { %s1268_s6 = sshll.u32 %s1884_s1, 4  ;;  %s1269_s6 = int_to_ptr.vmem [resolvable:$true] %s1268_s6 }
 0x2e8   :  { %s1852_s5 = scalar_lea.vmem %s1269_s6, 1024  ;;  %p1857_p11 = scmp.lt.s32.totalorder %s1269_s6, %s1269_s6 }
 0x2e9   :  { %p1853_p10 = scmp.ne.s32.totalorder %s1269_s6, %s1852_s5  ;;  %p1858_p12 = scmp.lt.s32.totalorder %s1852_s5, %s1852_s5 }
 0x2eb   :  { %p1859_p13 = por %p1858_p12, %p1857_p11 }
 0x2ed   :  { %p1860_p0 = pnand %p1859_p13, %p1853_p10 }
 0x382   :  { %v1036_v15 = vpop.f32.mrf.mxu0  ;;  %v1107_v16 = vpop.f32.mrf.mxu1 }
 0x383   :  { %1254 = vst [vmem:[#allocation5] sm:$0xff] %v1036_v15  ;;  %1256 = vst [vmem:[#allocation5 + $0x10] sm:$0xff] %v1107_v16 }
 0x384   :  { %v1038_v17 = vpop.f32.mrf.mxu0  ;;  %v1109_v55 = vpop.f32.mrf.mxu1 }
 0x385   :  { %1255 = vst [vmem:[#allocation5 + $0x8] sm:$0xff] %v1038_v17  ;;  %1257 = vst [vmem:[#allocation5 + $0x18] sm:$0xff] %v1109_v55 }
 0x3a3   :  { %v1178_v18 = vpop.f32.mrf.mxu0  ;;  %v1249_v19 = vpop.f32.mrf.mxu1 }
 0x3a4   :  { %1258 = vst [vmem:[#allocation5 + $0x20] sm:$0xff] %v1178_v18  ;;  %1260 = vst [vmem:[#allocation5 + $0x30] sm:$0xff] %v1249_v19 }
 0x3a5   :  { %v1180_v20 = vpop.f32.mrf.mxu0  ;;  %v1251_v21 = vpop.f32.mrf.mxu1 }
 0x3a6   :  { %1259 = vst [vmem:[#allocation5 + $0x28] sm:$0xff] %v1180_v20  ;;  %1261 = vst [vmem:[#allocation5 + $0x38] sm:$0xff] %v1251_v21 }
 0x3a7   :  { %1863 = shalt.err (!%p1860_p0)
}
 0x3a8   :  { %1271 = dma.vmem_to_hbm [thread:$0]  %s1269_s6, 1024, %s2368_s4, [#allocation4]  }
 0x3a9   :  { %1874 = dma.done.wait [#allocation4], 1024  }
 0x3aa   :  { %1875 = vsyncadd [#allocation4], 4294966272 }
 0x3ab   :  { %1876 = dma.done.wait [#allocation7], 128  }
 0x3ac   :  { %1877 = vsyncadd [#allocation7], 4294967168 }
 0x3ad   :  { %1288 = vsyncpa [#allocation3], 1 }
 0x3ae   :  { %1289 = vsyncpa [#allocation4], 1 }
 0x3af   :  { %1290 = vsyncpa [#allocation7], 1 }

</bundles_post_ra>
